<compile_context>
chip_gen: v5e
topology: v5e:2x2
jax: 0.10.0
libtpu: 0.0.40
codegen_flags: <defaults>
</compile_context>

<pallas_src>
import functools

import jax
import jax.numpy as jnp
from jax.experimental import pallas as pl
from jax.experimental.pallas import tpu as pltpu

_MIB = 1024 * 1024

# Per generation:
#   (target bytes per input block,           -> amortizes ~0.35us step overhead
#    VMEM ceiling for the live working set,  -> inputs x 2 buffers + f32 temps
#    default scoped VMEM,                    -> only raise the limit above this
#    max vmem_limit_bytes we will request)
_GEN_PARAMS = {
    "v5e":     (2 * _MIB, 12 * _MIB, 16 * _MIB, 32 * _MIB),
    "v6e":     (4 * _MIB, 30 * _MIB, 32 * _MIB, 64 * _MIB),
    "v7x":     (5 * _MIB, 36 * _MIB, 32 * _MIB, 48 * _MIB),
    "unknown": (2 * _MIB, 12 * _MIB, 16 * _MIB, 32 * _MIB),
}


def _tpu_generation():
    try:
        kind = jax.devices()[0].device_kind.lower()
    except Exception:
        return "unknown"
    if "v5 lite" in kind or "v5lite" in kind or "v5e" in kind:
        return "v5e"
    if "v6" in kind:
        return "v6e"
    if "v7" in kind:
        return "v7x"
    return "unknown"


def _round_up(x, m):
    return -(-x // m) * m


def _l2_loss_kernel(gt_ref, g_ref, out_ref, *, tile_rows, tile_cols,
                    rows_per_core, total_row_steps, total_rows, total_cols,
                    feat_chunked):
    c = pl.program_id(0)   # core-split axis     ("parallel")
    i = pl.program_id(1)   # row-tile reduction  ("arbitrary")
    j = pl.program_id(2)   # feature-chunk axis  ("arbitrary")

    # The (8, tile_cols) output block is resident across (i, j); zero it once.
    @pl.when((i == 0) & (j == 0))
    def _():
        out_ref[...] = jnp.zeros_like(out_ref)

    step = c * rows_per_core + i
    is_live = step < total_row_steps                     # dead tail on odd splits
    ragged = (step + 1) * tile_rows > total_rows
    if feat_chunked:
        ragged = ragged | ((j + 1) * tile_cols > total_cols)

    def accumulate(apply_mask):
        def body():
            d = gt_ref[...].astype(jnp.float32) - g_ref[...].astype(jnp.float32)
            sq = d * d
            if apply_mask:
                keep = (jax.lax.broadcasted_iota(jnp.int32, sq.shape, 0)
                        + step * tile_rows) < total_rows
                if feat_chunked:
                    keep = keep & (
                        (jax.lax.broadcasted_iota(jnp.int32, sq.shape, 1)
                         + j * tile_cols) < total_cols)
                # Select (not multiply) so garbage/NaN in padded rows can't leak.
                sq = jnp.where(keep, sq, 0.0)
            # Leading-axis reduce onto the resident (8, tile_cols) accumulator:
            # pure VALU adds, no per-step sublane/cross-lane fold.
            out_ref[...] += jnp.sum(
                sq.reshape(tile_rows // 8, 8, tile_cols), axis=0)
        return body

    # Interior tiles take the unmasked path; only boundary tiles pay for the
    # iota/compare/select.  Dead tail steps do nothing.
    pl.when(is_live & ragged)(accumulate(True))
    pl.when(is_live & jnp.logical_not(ragged))(accumulate(False))


def _plan_tiling(B, D, itemsize, tile_rows, tile_cols, gen):
    """Pick (tile_rows, tile_cols, n_feat, row_steps, cores, rows/core, chunked)."""
    target, ceiling, _, _ = _GEN_PARAMS[gen]
    # Live VMEM bytes per block element: 2 inputs x 2 pipeline buffers of the
    # input dtype plus ~3 concurrently-live f32 elementwise temporaries.
    per_elem = 4 * itemsize + 12
    row_cap = _round_up(B, 8)                  # never need more rows than this

    td = D
    if tile_cols is not None and tile_cols < D:
        td = min(_round_up(int(tile_cols), 128), _round_up(D, 128))
        if td >= D:
            td = D

    if tile_rows is not None:
        tb = min(_round_up(int(tile_rows), 8), row_cap)
    else:
        tb = min(target // max(td * itemsize, 1),
                 ceiling // max(td * per_elem, 1))
        if tb >= row_cap:
            tb = row_cap
        elif tb >= 32:
            tb = (tb // 32) * 32               # multiple of 32: clean bf16 packing
        else:
            # Rows alone cannot amortize step overhead within VMEM (very wide
            # features): fix a small row tile and chunk the feature axis.
            tb = min(32, row_cap)
            if td == D:
                td = min(target // max(tb * itemsize, 1),
                         ceiling // max(tb * per_elem, 1))
                td = max(128, (td // 128) * 128)
                td = min(td, _round_up(D, 128))
                if td >= D:
                    td = D

    feat_chunked = td < D
    n_feat = pl.cdiv(D, td) if feat_chunked else 1
    total_row_steps = pl.cdiv(B, tb)
    num_cores = 2 if total_row_steps >= 2 else 1     # v7x megacore split
    rows_per_core = pl.cdiv(total_row_steps, num_cores)
    return tb, td, n_feat, total_row_steps, num_cores, rows_per_core, feat_chunked


def l2_loss(g_gt, g, train_batchsize=None, *, tile_rows=None, tile_cols=None):
    """Pallas L2Loss.forward: mean over batch of per-row sum of squared diffs."""
    assert g_gt.shape == g.shape and g_gt.ndim == 2
    B, D = g_gt.shape
    itemsize = jnp.dtype(g_gt.dtype).itemsize
    gen = _tpu_generation()
    (tb, td, n_feat, total_row_steps, num_cores,
     rows_per_core, feat_chunked) = _plan_tiling(B, D, itemsize,
                                                 tile_rows, tile_cols, gen)

    def in_map(c, i, j):
        # Clamp the row-block index so the dead tail step of an odd core split
        # never issues a fully out-of-bounds DMA (its compute is skipped by
        # pl.when).  Ragged edge blocks are handled by the in-kernel mask.
        return (jnp.minimum(c * rows_per_core + i, total_row_steps - 1), j)

    kernel = functools.partial(
        _l2_loss_kernel, tile_rows=tb, tile_cols=td,
        rows_per_core=rows_per_core, total_row_steps=total_row_steps,
        total_rows=B, total_cols=D, feat_chunked=feat_chunked)

    # Generation-aware compiler params: raise scoped VMEM only when needed.
    _, _, default_scoped, limit_cap = _GEN_PARAMS[gen]
    vmem_est = (tb * td * (4 * itemsize + 12)   # inputs (2x2 buf) + f32 temps
                + 8 * td * 4                    # resident output accumulator
                + 2 * _MIB)                     # internal-scratch headroom
    cp_kwargs = dict(dimension_semantics=("parallel", "arbitrary", "arbitrary"))
    if vmem_est > default_scoped:
        cp_kwargs["vmem_limit_bytes"] = int(min(vmem_est + vmem_est // 4,
                                                limit_cap))

    cost = pl.CostEstimate(
        flops=3 * B * D, transcendentals=0,
        bytes_accessed=2 * B * D * itemsize + num_cores * 8 * td * 4)

    partials = pl.pallas_call(
        kernel,
        out_shape=jax.ShapeDtypeStruct((num_cores * 8, td), jnp.float32),
        grid_spec=pltpu.PrefetchScalarGridSpec(
            num_scalar_prefetch=0,
            grid=(num_cores, rows_per_core, n_feat),
            in_specs=[pl.BlockSpec((tb, td), in_map),
                      pl.BlockSpec((tb, td), in_map)],
            out_specs=pl.BlockSpec((8, td), lambda c, i, j: (c, 0)),
        ),
        compiler_params=pltpu.CompilerParams(**cp_kwargs),
        cost_estimate=cost,
    )(g_gt, g)

    # Tiny epilogue in plain JAX: fold the lane-dense per-core partials and
    # divide by the batch size (== torch.mean over dim 0).
    return jnp.sum(partials) / jnp.float32(B)


if __name__ == "__main__":
    key = jax.random.PRNGKey(0)
    k1, k2, k3, k4, k5, k6 = jax.random.split(key, 6)

    def ref_l2(a, b):
        a32 = a.astype(jnp.float32)
        b32 = b.astype(jnp.float32)
        return jnp.mean(jnp.sum((a32 - b32) ** 2, axis=1))

    # Case 1: small aligned shape, auto (single-block) tiling.
    B1, D1 = 8, 128
    a1 = jax.random.normal(k1, (B1, D1), dtype=jnp.float32)
    b1 = jax.random.normal(k2, (B1, D1), dtype=jnp.float32)
    out1 = jax.block_until_ready(l2_loss(a1, b1, train_batchsize=B1))
    assert jnp.allclose(out1, ref_l2(a1, b1), rtol=1e-5, atol=1e-4), out1

    # Case 2: forced small row tile -> 2-core split, odd step count (one dead
    # tail step on core 1) and a ragged last row tile.
    B2, D2 = 72, 128
    a2 = jax.random.normal(k3, (B2, D2), dtype=jnp.float32)
    b2 = jax.random.normal(k4, (B2, D2), dtype=jnp.float32)
    out2 = jax.block_until_ready(
        l2_loss(a2, b2, train_batchsize=B2, tile_rows=32))
    assert jnp.allclose(out2, ref_l2(a2, b2), rtol=1e-5, atol=1e-4), out2

    # Case 3: bf16 inputs (half the HBM bytes), ragged batch; math stays f32.
    a3 = a2[:44].astype(jnp.bfloat16)
    b3 = b2[:44].astype(jnp.bfloat16)
    out3 = jax.block_until_ready(
        l2_loss(a3, b3, train_batchsize=44, tile_rows=32))
    assert jnp.allclose(out3, ref_l2(a3, b3), rtol=1e-2, atol=1e-2), out3

    # Case 4: forced feature-axis chunking with a ragged last feature chunk.
    B4, D4 = 24, 300
    a4 = jax.random.normal(k5, (B4, D4), dtype=jnp.float32)
    b4 = jax.random.normal(k6, (B4, D4), dtype=jnp.float32)
    out4 = jax.block_until_ready(
        l2_loss(a4, b4, train_batchsize=B4, tile_cols=128))
    assert jnp.allclose(out4, ref_l2(a4, b4), rtol=1e-5, atol=1e-4), out4

    print("KERNEL_OK")
</pallas_src>

<mosaic_0001>
module attributes {stable_mosaic.version = 11 : i64} {
  func.func @_l2_loss_kernel(%arg0: i32, %arg1: i32, %arg2: i32, %arg3: memref<8x128xf32, #tpu.memory_space<vmem>>, %arg4: memref<8x128xf32, #tpu.memory_space<vmem>>, %arg5: memref<8x128xf32, #tpu.memory_space<vmem>>) attributes {dimension_semantics = [#tpu.dimension_semantics<parallel>, #tpu.dimension_semantics<arbitrary>, #tpu.dimension_semantics<arbitrary>], iteration_bounds = array<i64: 1, 1, 1>, scalar_prefetch = 0 : i64, scratch_operands = 0 : i64, tpu.core_type = #tpu.core_type<tc>, window_params = [{transform_indices = @transform_0, window_bounds = array<i64: 8, 128>}, {transform_indices = @transform_1, window_bounds = array<i64: 8, 128>}, {transform_indices = @transform_2, window_bounds = array<i64: 8, 128>}]} {
    %c0_i32 = arith.constant 0 : i32
    %0 = arith.cmpi eq, %arg1, %c0_i32 : i32
    %c0_i32_0 = arith.constant 0 : i32
    %1 = arith.cmpi eq, %arg2, %c0_i32_0 : i32
    %2 = arith.andi %0, %1 : i1
    %3 = arith.extui %2 : i1 to i32
    %c0_i32_1 = arith.constant 0 : i32
    %4 = arith.cmpi ne, %3, %c0_i32_1 : i32
    scf.if %4 {
      %cst = arith.constant 0.000000e+00 : f32
      %18 = vector.broadcast %cst : f32 to vector<8x128xf32>
      %c0 = arith.constant 0 : index
      %c0_7 = arith.constant 0 : index
      %19 = vector.load %arg5[%c0, %c0_7] : memref<8x128xf32, #tpu.memory_space<vmem>>, vector<8x128xf32>
      tpu.vector_store %arg5[%c0, %c0_7], %18 {strides = array<i32>} : memref<8x128xf32, #tpu.memory_space<vmem>>, vector<8x128xf32>,
    } else {
    }
    %c1_i32 = arith.constant 1 : i32
    %5 = arith.muli %arg0, %c1_i32 : i32
    %6 = arith.addi %5, %arg1 : i32
    %c1_i32_2 = arith.constant 1 : i32
    %7 = arith.cmpi slt, %6, %c1_i32_2 : i32
    %c1_i32_3 = arith.constant 1 : i32
    %8 = arith.addi %6, %c1_i32_3 : i32
    %c8_i32 = arith.constant 8 : i32
    %9 = arith.muli %8, %c8_i32 : i32
    %c8_i32_4 = arith.constant 8 : i32
    %10 = arith.cmpi sgt, %9, %c8_i32_4 : i32
    %11 = arith.andi %7, %10 : i1
    %12 = arith.extui %11 : i1 to i32
    %c0_i32_5 = arith.constant 0 : i32
    %13 = arith.cmpi ne, %12, %c0_i32_5 : i32
    scf.if %13 {
      %c0 = arith.constant 0 : index
      %c0_7 = arith.constant 0 : index
      %18 = vector.load %arg3[%c0, %c0_7] : memref<8x128xf32, #tpu.memory_space<vmem>>, vector<8x128xf32>
      %c0_8 = arith.constant 0 : index
      %c0_9 = arith.constant 0 : index
      %19 = vector.load %arg4[%c0_8, %c0_9] : memref<8x128xf32, #tpu.memory_space<vmem>>, vector<8x128xf32>
      %20 = arith.subf %18, %19 : vector<8x128xf32>
      %21 = arith.mulf %20, %20 : vector<8x128xf32>
      %22 = tpu.iota {dimensions = array<i32: 0>} : vector<8x128xi32>
      %c8_i32_10 = arith.constant 8 : i32
      %23 = arith.muli %6, %c8_i32_10 : i32
      %24 = vector.broadcast %23 : i32 to vector<8x128xi32>
      %25 = arith.addi %22, %24 : vector<8x128xi32>
      %c8_i32_11 = arith.constant 8 : i32
      %26 = vector.broadcast %c8_i32_11 : i32 to vector<8x128xi32>
      %27 = arith.cmpi slt, %25, %26 : vector<8x128xi32>
      %cst = arith.constant 0.000000e+00 : f32
      %28 = vector.broadcast %cst : f32 to vector<8x128xf32>
      %29 = arith.select %27, %21, %28 : vector<8x128xi1>, vector<8x128xf32>
      %c0_12 = arith.constant 0 : index
      %c0_13 = arith.constant 0 : index
      %30 = vector.load %arg5[%c0_12, %c0_13] : memref<8x128xf32, #tpu.memory_space<vmem>>, vector<8x128xf32>
      %31 = vector.shape_cast %29 : vector<8x128xf32> to vector<1x8x128xf32>
      %cst_14 = arith.constant dense<0.000000e+00> : vector<8x128xf32>
      %32 = vector.multi_reduction <add>, %31, %cst_14 [0] : vector<1x8x128xf32> to vector<8x128xf32>
      %33 = arith.addf %30, %32 : vector<8x128xf32>
      %c0_15 = arith.constant 0 : index
      %c0_16 = arith.constant 0 : index
      %34 = vector.load %arg5[%c0_15, %c0_16] : memref<8x128xf32, #tpu.memory_space<vmem>>, vector<8x128xf32>
      tpu.vector_store %arg5[%c0_15, %c0_16], %33 {strides = array<i32>} : memref<8x128xf32, #tpu.memory_space<vmem>>, vector<8x128xf32>,
    } else {
    }
    %true = arith.constant true
    %14 = arith.xori %10, %true : i1
    %15 = arith.andi %7, %14 : i1
    %16 = arith.extui %15 : i1 to i32
    %c0_i32_6 = arith.constant 0 : i32
    %17 = arith.cmpi ne, %16, %c0_i32_6 : i32
    scf.if %17 {
      %c0 = arith.constant 0 : index
      %c0_7 = arith.constant 0 : index
      %18 = vector.load %arg3[%c0, %c0_7] : memref<8x128xf32, #tpu.memory_space<vmem>>, vector<8x128xf32>
      %c0_8 = arith.constant 0 : index
      %c0_9 = arith.constant 0 : index
      %19 = vector.load %arg4[%c0_8, %c0_9] : memref<8x128xf32, #tpu.memory_space<vmem>>, vector<8x128xf32>
      %20 = arith.subf %18, %19 : vector<8x128xf32>
      %21 = arith.mulf %20, %20 : vector<8x128xf32>
      %c0_10 = arith.constant 0 : index
      %c0_11 = arith.constant 0 : index
      %22 = vector.load %arg5[%c0_10, %c0_11] : memref<8x128xf32, #tpu.memory_space<vmem>>, vector<8x128xf32>
      %23 = vector.shape_cast %21 : vector<8x128xf32> to vector<1x8x128xf32>
      %cst = arith.constant dense<0.000000e+00> : vector<8x128xf32>
      %24 = vector.multi_reduction <add>, %23, %cst [0] : vector<1x8x128xf32> to vector<8x128xf32>
      %25 = arith.addf %22, %24 : vector<8x128xf32>
      %c0_12 = arith.constant 0 : index
      %c0_13 = arith.constant 0 : index
      %26 = vector.load %arg5[%c0_12, %c0_13] : memref<8x128xf32, #tpu.memory_space<vmem>>, vector<8x128xf32>
      tpu.vector_store %arg5[%c0_12, %c0_13], %25 {strides = array<i32>} : memref<8x128xf32, #tpu.memory_space<vmem>>, vector<8x128xf32>,
    } else {
    }
    return
  }
  func.func @transform_0(%arg0: i32, %arg1: i32, %arg2: i32) -> (i32, i32) {
    %c1_i32 = arith.constant 1 : i32
    %0 = arith.muli %arg0, %c1_i32 : i32
    %1 = arith.addi %0, %arg1 : i32
    %c0_i32 = arith.constant 0 : i32
    %2 = arith.minsi %1, %c0_i32 : i32
    %c0_i32_0 = arith.constant 0 : i32
    return %2, %arg2 : i32, i32
  }
  func.func @transform_1(%arg0: i32, %arg1: i32, %arg2: i32) -> (i32, i32) {
    %c1_i32 = arith.constant 1 : i32
    %0 = arith.muli %arg0, %c1_i32 : i32
    %1 = arith.addi %0, %arg1 : i32
    %c0_i32 = arith.constant 0 : i32
    %2 = arith.minsi %1, %c0_i32 : i32
    %c0_i32_0 = arith.constant 0 : i32
    return %2, %arg2 : i32, i32
  }
  func.func @transform_2(%arg0: i32, %arg1: i32, %arg2: i32) -> (i32, i32) {
    %c0_i32 = arith.constant 0 : i32
    %c0_i32_0 = arith.constant 0 : i32
    return %arg0, %c0_i32 : i32, i32
  }
}

</mosaic_0001>

<bundles_post_ra>
// kernel: tpu_custom_call.1
= control target key start
LH: loop header
LB: loop body
LE: loop exit
PB: predicated region body
PF: predicated region fallthrough
CT: control target
= control target key end

     0   :  { %7 = vsyncpa [#allocation3], 0  ;;  %s231_s0 = inlined_call_operand.hbm [shape: f32[8,128], index: 0, kind: input, shape index: {}]   ;;  %s232_s1 = inlined_call_operand.hbm [shape: f32[8,128], index: 1, kind: input, shape index: {}]   ;;  %s233_s2 = inlined_call_operand.hbm [shape: f32[8,128], index: 2, kind: output, shape index: {}]  }
   0x1   :  { %8 = vsyncpa [#allocation6], 0 }
   0x2   :  { %9 = vsyncpa [#allocation4], 0  ;;  %s20_s11 = sshll.u32 %s231_s0, 4  ;;  %s204_s12 = smov [#allocation2]   ;;  %s21_s11 = int_to_ptr.hbm [resolvable:$true] %s20_s11 }
   0x3   :  { %s22_s13 = sshll.u32 %s204_s12, 4  ;;  %s36_s16 = sshll.u32 %s232_s1, 4  ;;  %s23_s13 = int_to_ptr.vmem [resolvable:$true] %s22_s13  ;;  %s37_s16 = int_to_ptr.hbm [resolvable:$true] %s36_s16 }
   0x4   :  { %25 = dma.hbm_to_vmem [thread:$0]  %s21_s11, 128, %s23_s13, [#allocation3]  }
   0x5   :  { %s205_s17 = smov [#allocation5]  }
   0x6   :  { %s38_s18 = sshll.u32 %s205_s17, 4  ;;  %s39_s18 = int_to_ptr.vmem [resolvable:$true] %s38_s18 }
   0x7   :  { %41 = dma.hbm_to_vmem [thread:$0]  %s37_s16, 128, %s39_s18, [#allocation6]  }
   0x8   :  { %198 = dma.done.wait [#allocation3], 128  }
   0x9   :  { %199 = vsyncadd [#allocation3], 4294967168 }
   0xa   :  { %200 = dma.done.wait [#allocation6], 128  }
   0xb   :  { %201 = vsyncadd [#allocation6], 4294967168  ;;  %v92_v0 = vld [vmem:[#allocation2] sm:$0xff]  ;;  %v93_v1 = vld [vmem:[#allocation5] sm:$0xff]  ;;  %s206_s0 = smov [#allocation7]   ;;  %s107_s22 = sshll.u32 %s233_s2, 4  ;;  %s108_s22 = int_to_ptr.hbm [resolvable:$true] %s107_s22 }
   0xc   :  { %v94_v2 = vsub.f32 %v92_v0, %v93_v1  ;;  %s105_s19 = sshll.u32 %s206_s0, 4  ;;  %s106_s19 = int_to_ptr.vmem [resolvable:$true] %s105_s19 }
   0xe   :  { %v95_v3 = vmul.f32 %v94_v2, %v94_v2 }
  0x10   :  { %99 = vst [vmem:[#allocation7] sm:$0xff] %v95_v3 }
  0x11   :  { %110 = dma.vmem_to_hbm [thread:$0]  %s106_s19, 128, %s108_s22, [#allocation4]  }
  0x12   :  { %202 = dma.done.wait [#allocation4], 128  }
  0x13   :  { %203 = vsyncadd [#allocation4], 4294967168 }
  0x14   :  { %115 = vsyncpa [#allocation3], 1 }
  0x15   :  { %116 = vsyncpa [#allocation6], 1 }
  0x16   :  { %117 = vsyncpa [#allocation4], 1 }

</bundles_post_ra>
